<compile_context>
chip_gen: v5e
topology: v5e:2x2
jax: 0.10.0
libtpu: 0.0.40
codegen_flags: <defaults>
</compile_context>

<pallas_src>
import functools

import jax
import jax.numpy as jnp
from jax import lax
from jax.experimental import pallas as pl
from jax.experimental.pallas import tpu as pltpu

_LANE = 128
_SUBLANE = 8


def _round_up(x, m):
    return (x + m - 1) // m * m


def _attention_kernel(q_ref, ctx_ref, win_t_ref, wmix_t_ref, wq_t_ref,
                      out_ref, attnw_ref, *, l_q_valid, l_q_pad):
    bb, tl, d_p = q_ref.shape
    cdt = ctx_ref.dtype                      # matmul-operand dtype (f32 or bf16)

    # linear_in (general method): (bb*tl, D) @ W_in.T  (weights pre-transposed)
    q2 = q_ref[...].reshape(bb * tl, d_p)
    qg2 = jnp.dot(q2, win_t_ref[...], preferred_element_type=jnp.float32)
    qg2_c = qg2.astype(cdt)

    ctx = ctx_ref[...]                       # (bb, L_q_p, D_p)

    # attention scores: batched contraction over D (no materialized transpose)
    scores = jnp.einsum('bqd,bkd->bqk', qg2_c.reshape(bb, tl, d_p), ctx,
                        preferred_element_type=jnp.float32)

    # mask zero-padded key positions (static condition: only emitted if padded)
    if l_q_valid < l_q_pad:
        kidx = lax.broadcasted_iota(jnp.int32, scores.shape, 2)
        scores = jnp.where(kidx < l_q_valid, scores, -1e30)

    # softmax over keys (f32; exp on EUP, approx reciprocal on EUP vrcp slot)
    m = jnp.max(scores, axis=-1, keepdims=True)
    e = jnp.exp(scores - m)
    wts = e * pl.reciprocal(jnp.sum(e, axis=-1, keepdims=True), approx=True)

    # mix = weights @ context
    mix = jnp.einsum('bqk,bkd->bqd', wts.astype(cdt), ctx,
                     preferred_element_type=jnp.float32)

    # linear_out on cat(mix, qg) == mix @ W_out[:, :D].T + qg @ W_out[:, D:].T
    mix2_c = mix.reshape(bb * tl, d_p).astype(cdt)
    out2 = (jnp.dot(mix2_c, wmix_t_ref[...], preferred_element_type=jnp.float32)
            + jnp.dot(qg2_c, wq_t_ref[...], preferred_element_type=jnp.float32))

    out_ref[...] = jnp.tanh(out2).reshape(bb, tl, d_p).astype(out_ref.dtype)
    attnw_ref[...] = wts.astype(attnw_ref.dtype)


def attention_general(query, context, w_in, w_out, *,
                      compute_dtype=None, row_tile=128,
                      vmem_budget_bytes=40 << 20):
    """query: (B, L_out, D), context: (B, L_q, D), w_in: (D, D), w_out: (D, 2D).

    compute_dtype: optional dtype (e.g. jnp.bfloat16) for matmul operands; the
    softmax / tanh / accumulation stay in float32.
    """
    B, L_out, D = query.shape
    L_q = context.shape[1]
    out_dtype = query.dtype
    cdt = jnp.dtype(compute_dtype) if compute_dtype is not None else jnp.dtype(query.dtype)

    # Lane-dense padding: last dims become multiples of 128 -> unmasked stores.
    D_p = _round_up(D, _LANE)
    L_q_p = _round_up(L_q, _LANE)
    TL = min(row_tile, _round_up(L_out, _SUBLANE))
    L_out_p = _round_up(L_out, TL)

    q_p = jnp.pad(query, ((0, 0), (0, L_out_p - L_out), (0, D_p - D))).astype(cdt)
    ctx_p = jnp.pad(context, ((0, 0), (0, L_q_p - L_q), (0, D_p - D))).astype(cdt)
    # Pre-transpose + split weights (glue) so the kernel does plain row-major matmuls.
    w_in_t = jnp.pad(w_in.T, ((0, D_p - D), (0, D_p - D))).astype(cdt)
    w_out_mix_t = jnp.pad(w_out[:, :D].T, ((0, D_p - D), (0, D_p - D))).astype(cdt)
    w_out_q_t = jnp.pad(w_out[:, D:].T, ((0, D_p - D), (0, D_p - D))).astype(cdt)

    in_bytes = q_p.dtype.itemsize

    # Fuse as many batch elements per grid step as fit the VMEM budget
    # (amortizes ~0.35us/step overhead; fills the MXU for small shapes).
    weights_bytes = 2 * 3 * D_p * D_p * in_bytes          # double-buffered weight tiles
    bb = 1
    for cand in range(1, B + 1):
        if B % cand:
            continue
        per_step = 2 * (cand * TL * D_p * in_bytes         # q block
                        + cand * L_q_p * D_p * in_bytes    # ctx block
                        + cand * TL * D_p * 4              # out block (f32)
                        + cand * TL * L_q_p * 4)           # attn-weight block (f32)
        if per_step + weights_bytes <= vmem_budget_bytes:
            bb = cand

    per_step_bytes = (2 * (bb * TL * D_p * in_bytes
                           + bb * L_q_p * D_p * in_bytes
                           + bb * TL * D_p * 4
                           + bb * TL * L_q_p * 4)
                      + weights_bytes)

    compiler_kwargs = dict(dimension_semantics=("parallel", "parallel"))
    if per_step_bytes > (32 << 20):
        # Sized against v7x's 64 MiB physical VMEM; raise above the 32 MiB default.
        compiler_kwargs["vmem_limit_bytes"] = int(min(per_step_bytes * 1.25, 56 << 20))

    # Advisory cost estimate so XLA schedules around the custom call sensibly.
    flops = 2 * B * L_out_p * (3 * D_p * D_p + 2 * D_p * L_q_p)
    transcendentals = B * L_out_p * (L_q_p + D_p + 1)
    bytes_accessed = ((B * L_out_p * D_p + B * L_q_p * D_p + 3 * D_p * D_p) * in_bytes
                      + B * L_out_p * D_p * jnp.dtype(out_dtype).itemsize
                      + B * L_out_p * L_q_p * 4)
    cost = pl.CostEstimate(flops=flops, transcendentals=transcendentals,
                           bytes_accessed=bytes_accessed)

    grid = (B // bb, L_out_p // TL)          # L_out innermost: ctx/weights stay resident
    grid_spec = pltpu.PrefetchScalarGridSpec(
        num_scalar_prefetch=0,
        grid=grid,
        in_specs=[
            pl.BlockSpec((bb, TL, D_p), lambda b, l: (b, l, 0)),
            pl.BlockSpec((bb, L_q_p, D_p), lambda b, l: (b, 0, 0)),
            pl.BlockSpec((D_p, D_p), lambda b, l: (0, 0)),
            pl.BlockSpec((D_p, D_p), lambda b, l: (0, 0)),
            pl.BlockSpec((D_p, D_p), lambda b, l: (0, 0)),
        ],
        out_specs=[
            pl.BlockSpec((bb, TL, D_p), lambda b, l: (b, l, 0)),
            pl.BlockSpec((bb, TL, L_q_p), lambda b, l: (b, l, 0)),
        ],
    )

    kernel = functools.partial(_attention_kernel, l_q_valid=L_q, l_q_pad=L_q_p)

    out_p, attnw_p = pl.pallas_call(
        kernel,
        out_shape=(jax.ShapeDtypeStruct((B, L_out_p, D_p), out_dtype),
                   jax.ShapeDtypeStruct((B, L_out_p, L_q_p), jnp.float32)),
        grid_spec=grid_spec,
        compiler_params=pltpu.CompilerParams(**compiler_kwargs),
        cost_estimate=cost,
    )(q_p, ctx_p, w_in_t, w_out_mix_t, w_out_q_t)

    return out_p[:, :L_out, :D], attnw_p[:, :L_out, :L_q]


def _reference(query, context, w_in, w_out):
    qg = jnp.einsum("bld,ed->ble", query, w_in)
    scores = jnp.einsum("bld,bkd->blk", qg, context)
    wts = jax.nn.softmax(scores, axis=-1)
    mix = jnp.einsum("blk,bkd->bld", wts, context)
    combined = jnp.concatenate([mix, qg], axis=-1)
    out = jnp.tanh(jnp.einsum("blc,dc->bld", combined, w_out))
    return out, wts


if __name__ == "__main__":
    # TODO(synk): nn.Dropout on the attention weights is not implemented (p=0.0 path only).
    B, L_out, L_q, D = 2, 8, 8, 32

    key = jax.random.PRNGKey(0)
    k_q, k_c, k_win, k_wout = jax.random.split(key, 4)

    query = jax.random.normal(k_q, (B, L_out, D), dtype=jnp.float32)
    context = jax.random.normal(k_c, (B, L_q, D), dtype=jnp.float32)
    # Deterministic synthetic parameters (PyTorch-style scale 1/sqrt(fan_in)).
    w_in = jax.random.uniform(k_win, (D, D), minval=-1.0, maxval=1.0) / jnp.sqrt(D)
    w_out = jax.random.uniform(k_wout, (D, 2 * D), minval=-1.0, maxval=1.0) / jnp.sqrt(2.0 * D)

    ref_out, ref_w = _reference(query, context, w_in, w_out)

    # float32 matmul operands (tight tolerance; approx reciprocal in softmax).
    out, attn_w = attention_general(query, context, w_in, w_out)
    out = jax.block_until_ready(out)
    attn_w = jax.block_until_ready(attn_w)
    assert jnp.allclose(out, ref_out, atol=5e-3, rtol=5e-3)
    assert jnp.allclose(attn_w, ref_w, atol=5e-3, rtol=5e-3)

    # bf16 matmul operands (v6e/v7x MXU peak), f32 softmax/tanh/accumulation.
    out_bf, attn_bf = attention_general(query, context, w_in, w_out,
                                        compute_dtype=jnp.bfloat16)
    out_bf = jax.block_until_ready(out_bf)
    attn_bf = jax.block_until_ready(attn_bf)
    assert jnp.allclose(out_bf, ref_out, atol=5e-2, rtol=5e-2)
    assert jnp.allclose(attn_bf, ref_w, atol=5e-2, rtol=5e-2)

    print("KERNEL_OK")
</pallas_src>

<mosaic_0001>
module attributes {stable_mosaic.version = 11 : i64} {
  func.func @_attention_kernel(%arg0: i32, %arg1: i32, %arg2: memref<2x8x128xf32, #tpu.memory_space<vmem>>, %arg3: memref<2x128x128xf32, #tpu.memory_space<vmem>>, %arg4: memref<128x128xf32, #tpu.memory_space<vmem>>, %arg5: memref<128x128xf32, #tpu.memory_space<vmem>>, %arg6: memref<128x128xf32, #tpu.memory_space<vmem>>, %arg7: memref<2x8x128xf32, #tpu.memory_space<vmem>>, %arg8: memref<2x8x128xf32, #tpu.memory_space<vmem>>) attributes {dimension_semantics = [#tpu.dimension_semantics<parallel>, #tpu.dimension_semantics<parallel>], iteration_bounds = array<i64: 1, 1>, scalar_prefetch = 0 : i64, scratch_operands = 0 : i64, tpu.core_type = #tpu.core_type<tc>, window_params = [{transform_indices = @transform_0, window_bounds = array<i64: 2, 8, 128>}, {transform_indices = @transform_1, window_bounds = array<i64: 2, 128, 128>}, {pipeline_mode = #tpu.pipeline_mode<synchronous>, transform_indices = @transform_2, window_bounds = array<i64: 128, 128>}, {pipeline_mode = #tpu.pipeline_mode<synchronous>, transform_indices = @transform_3, window_bounds = array<i64: 128, 128>}, {pipeline_mode = #tpu.pipeline_mode<synchronous>, transform_indices = @transform_4, window_bounds = array<i64: 128, 128>}, {transform_indices = @transform_5, window_bounds = array<i64: 2, 8, 128>}, {transform_indices = @transform_6, window_bounds = array<i64: 2, 8, 128>}]} {
    %c0 = arith.constant 0 : index
    %c0_0 = arith.constant 0 : index
    %c0_1 = arith.constant 0 : index
    %0 = vector.load %arg2[%c0, %c0_0, %c0_1] : memref<2x8x128xf32, #tpu.memory_space<vmem>>, vector<2x8x128xf32>
    %1 = vector.shape_cast %0 : vector<2x8x128xf32> to vector<16x128xf32>
    %c0_2 = arith.constant 0 : index
    %c0_3 = arith.constant 0 : index
    %2 = vector.load %arg4[%c0_2, %c0_3] : memref<128x128xf32, #tpu.memory_space<vmem>>, vector<128x128xf32>
    %cst = arith.constant dense<0.000000e+00> : vector<16x128xf32>
    %3 = tpu.matmul %1, %2, %cst {dimension_numbers = #tpu.dot_dimension_numbers<[1], [0], [0], [1], [0, 0, 1, 1], [], []>} : vector<16x128xf32>, vector<128x128xf32>, vector<16x128xf32> -> vector<16x128xf32>
    %c0_4 = arith.constant 0 : index
    %c0_5 = arith.constant 0 : index
    %c0_6 = arith.constant 0 : index
    %4 = vector.load %arg3[%c0_4, %c0_5, %c0_6] : memref<2x128x128xf32, #tpu.memory_space<vmem>>, vector<2x128x128xf32>
    %5 = vector.shape_cast %3 : vector<16x128xf32> to vector<2x8x128xf32>
    "tpu.trace_start"() <{level = 10 : i32, message = "bqd,bkd->bqk"}> : () -> ()
    %cst_7 = arith.constant dense<0.000000e+00> : vector<2x8x128xf32>
    %6 = tpu.matmul %5, %4, %cst_7 {dimension_numbers = #tpu.dot_dimension_numbers<[2], [2], [1], [1], [0, 0, 0, 1, 1, 1], [0], [0]>} : vector<2x8x128xf32>, vector<2x128x128xf32>, vector<2x8x128xf32> -> vector<2x8x128xf32>
    "tpu.trace_stop"() : () -> ()
    %7 = tpu.iota {dimensions = array<i32: 2>} : vector<2x8x128xi32>
    %c8_i32 = arith.constant 8 : i32
    %8 = vector.broadcast %c8_i32 : i32 to vector<2x8x128xi32>
    %9 = arith.cmpi slt, %7, %8 : vector<2x8x128xi32>
    %cst_8 = arith.constant -1.000000e+30 : f32
    %10 = vector.broadcast %cst_8 : f32 to vector<2x8x128xf32>
    %11 = arith.select %9, %6, %10 : vector<2x8x128xi1>, vector<2x8x128xf32>
    %cst_9 = arith.constant dense<0xFF800000> : vector<2x8xf32>
    %12 = vector.multi_reduction <maximumf>, %11, %cst_9 [2] : vector<2x8x128xf32> to vector<2x8xf32>
    %13 = vector.shape_cast %12 : vector<2x8xf32> to vector<2x8x1xf32>
    %14 = vector.broadcast %13 : vector<2x8x1xf32> to vector<2x8x128xf32>
    %15 = arith.subf %11, %14 : vector<2x8x128xf32>
    %16 = math.exp %15 : vector<2x8x128xf32>
    %cst_10 = arith.constant dense<0.000000e+00> : vector<2x8xf32>
    %17 = vector.multi_reduction <add>, %16, %cst_10 [2] : vector<2x8x128xf32> to vector<2x8xf32>
    %18 = vector.shape_cast %17 : vector<2x8xf32> to vector<2x8x1xf32>
    %19 = tpu.reciprocal %18 {approx = true} : vector<2x8x1xf32> -> vector<2x8x1xf32>
    %20 = vector.broadcast %19 : vector<2x8x1xf32> to vector<2x8x128xf32>
    %21 = arith.mulf %16, %20 : vector<2x8x128xf32>
    "tpu.trace_start"() <{level = 10 : i32, message = "bqk,bkd->bqd"}> : () -> ()
    %cst_11 = arith.constant dense<0.000000e+00> : vector<2x8x128xf32>
    %22 = tpu.matmul %21, %4, %cst_11 {dimension_numbers = #tpu.dot_dimension_numbers<[2], [1], [1], [2], [0, 0, 0, 1, 1, 2], [0], [0]>} : vector<2x8x128xf32>, vector<2x128x128xf32>, vector<2x8x128xf32> -> vector<2x8x128xf32>
    "tpu.trace_stop"() : () -> ()
    %23 = vector.shape_cast %22 : vector<2x8x128xf32> to vector<16x128xf32>
    %c0_12 = arith.constant 0 : index
    %c0_13 = arith.constant 0 : index
    %24 = vector.load %arg5[%c0_12, %c0_13] : memref<128x128xf32, #tpu.memory_space<vmem>>, vector<128x128xf32>
    %cst_14 = arith.constant dense<0.000000e+00> : vector<16x128xf32>
    %25 = tpu.matmul %23, %24, %cst_14 {dimension_numbers = #tpu.dot_dimension_numbers<[1], [0], [0], [1], [0, 0, 1, 1], [], []>} : vector<16x128xf32>, vector<128x128xf32>, vector<16x128xf32> -> vector<16x128xf32>
    %c0_15 = arith.constant 0 : index
    %c0_16 = arith.constant 0 : index
    %26 = vector.load %arg6[%c0_15, %c0_16] : memref<128x128xf32, #tpu.memory_space<vmem>>, vector<128x128xf32>
    %cst_17 = arith.constant dense<0.000000e+00> : vector<16x128xf32>
    %27 = tpu.matmul %3, %26, %cst_17 {dimension_numbers = #tpu.dot_dimension_numbers<[1], [0], [0], [1], [0, 0, 1, 1], [], []>} : vector<16x128xf32>, vector<128x128xf32>, vector<16x128xf32> -> vector<16x128xf32>
    %28 = arith.addf %25, %27 : vector<16x128xf32>
    %29 = math.tanh %28 : vector<16x128xf32>
    %30 = vector.shape_cast %29 : vector<16x128xf32> to vector<2x8x128xf32>
    %c0_18 = arith.constant 0 : index
    %c0_19 = arith.constant 0 : index
    %c0_20 = arith.constant 0 : index
    %31 = vector.load %arg7[%c0_18, %c0_19, %c0_20] : memref<2x8x128xf32, #tpu.memory_space<vmem>>, vector<2x8x128xf32>
    tpu.vector_store %arg7[%c0_18, %c0_19, %c0_20], %30 {strides = array<i32>} : memref<2x8x128xf32, #tpu.memory_space<vmem>>, vector<2x8x128xf32>,
    %c0_21 = arith.constant 0 : index
    %c0_22 = arith.constant 0 : index
    %c0_23 = arith.constant 0 : index
    %32 = vector.load %arg8[%c0_21, %c0_22, %c0_23] : memref<2x8x128xf32, #tpu.memory_space<vmem>>, vector<2x8x128xf32>
    tpu.vector_store %arg8[%c0_21, %c0_22, %c0_23], %21 {strides = array<i32>} : memref<2x8x128xf32, #tpu.memory_space<vmem>>, vector<2x8x128xf32>,
    return
  }
  func.func @transform_0(%arg0: i32, %arg1: i32) -> (i32, i32, i32) {
    %c0_i32 = arith.constant 0 : i32
    %c0_i32_0 = arith.constant 0 : i32
    return %arg0, %arg1, %c0_i32 : i32, i32, i32
  }
  func.func @transform_1(%arg0: i32, %arg1: i32) -> (i32, i32, i32) {
    %c0_i32 = arith.constant 0 : i32
    %c0_i32_0 = arith.constant 0 : i32
    %c0_i32_1 = arith.constant 0 : i32
    return %arg0, %c0_i32, %c0_i32_0 : i32, i32, i32
  }
  func.func @transform_2(%arg0: i32, %arg1: i32) -> (i32, i32) {
    %c0_i32 = arith.constant 0 : i32
    %c0_i32_0 = arith.constant 0 : i32
    %c0_i32_1 = arith.constant 0 : i32
    return %c0_i32, %c0_i32_0 : i32, i32
  }
  func.func @transform_3(%arg0: i32, %arg1: i32) -> (i32, i32) {
    %c0_i32 = arith.constant 0 : i32
    %c0_i32_0 = arith.constant 0 : i32
    %c0_i32_1 = arith.constant 0 : i32
    return %c0_i32, %c0_i32_0 : i32, i32
  }
  func.func @transform_4(%arg0: i32, %arg1: i32) -> (i32, i32) {
    %c0_i32 = arith.constant 0 : i32
    %c0_i32_0 = arith.constant 0 : i32
    %c0_i32_1 = arith.constant 0 : i32
    return %c0_i32, %c0_i32_0 : i32, i32
  }
  func.func @transform_5(%arg0: i32, %arg1: i32) -> (i32, i32, i32) {
    %c0_i32 = arith.constant 0 : i32
    %c0_i32_0 = arith.constant 0 : i32
    return %arg0, %arg1, %c0_i32 : i32, i32, i32
  }
  func.func @transform_6(%arg0: i32, %arg1: i32) -> (i32, i32, i32) {
    %c0_i32 = arith.constant 0 : i32
    %c0_i32_0 = arith.constant 0 : i32
    return %arg0, %arg1, %c0_i32 : i32, i32, i32
  }
}

</mosaic_0001>

<bundles_post_ra>
// kernel: tpu_custom_call.1
= control target key start
LH: loop header
LB: loop body
LE: loop exit
PB: predicated region body
PF: predicated region fallthrough
CT: control target
= control target key end

     0   :  { %12 = vsyncpa [#allocation3], 0  ;;  %s706_s0 = inlined_call_operand.hbm [shape: f32[2,8,128], index: 0, kind: input, shape index: {}]   ;;  %s707_s1 = inlined_call_operand.hbm [shape: f32[2,128,128], index: 1, kind: input, shape index: {}]   ;;  %s708_s2 = inlined_call_operand.hbm [shape: f32[128,128], index: 2, kind: input, shape index: {}]   ;;  %s709_s3 = inlined_call_operand.hbm [shape: f32[128,128], index: 3, kind: input, shape index: {}]   ;;  %s710_s4 = inlined_call_operand.hbm [shape: f32[128,128], index: 4, kind: input, shape index: {}]   ;;  %s711_s5 = inlined_call_operand.hbm [shape: f32[2,8,128], index: 5, kind: output, shape index: {0}]   ;;  %s712_s6 = inlined_call_operand.hbm [shape: f32[2,8,128], index: 6, kind: output, shape index: {1}]  }
   0x1   :  { %13 = vsyncpa [#allocation6], 0 }
   0x2   :  { %14 = vsyncpa [#allocation9], 0 }
   0x3   :  { %15 = vsyncpa [#allocation4], 0 }
   0x4   :  { %16 = vsyncpa [#allocation13], 0  ;;  %s34_s23 = sshll.u32 %s707_s1, 4  ;;  %s600_s24 = smov [#allocation5]   ;;  %s35_s23 = int_to_ptr.hbm [resolvable:$true] %s34_s23 }
   0x5   :  { %s36_s25 = sshll.u32 %s600_s24, 4  ;;  %s60_s28 = sshll.u32 %s709_s3, 4  ;;  %s37_s25 = int_to_ptr.vmem [resolvable:$true] %s36_s25  ;;  %s61_s28 = int_to_ptr.hbm [resolvable:$true] %s60_s28 }
   0x6   :  { %s601_s29 = smov 128   ;;  %s602_s30 = smov 8  }
   0x7   :  { %42 = dma.hbm_to_vmem [thread:$0]  %s35_s23, 4096, %s37_s25, [#allocation6], %s601_s29, %s601_s29, %s602_s30  }
   0x8   :  { %s603_s7 = smov [#allocation8]   ;;  %s21_s1 = sshll.u32 %s706_s0, 4  ;;  %s22_s1 = int_to_ptr.hbm [resolvable:$true] %s21_s1 }
   0x9   :  { %s62_s8 = sshll.u32 %s603_s7, 4  ;;  %s47_s12 = sshll.u32 %s708_s2, 4  ;;  %s63_s8 = int_to_ptr.vmem [resolvable:$true] %s62_s8  ;;  %s48_s12 = int_to_ptr.hbm [resolvable:$true] %s47_s12 }
   0xa   :  { %68 = dma.hbm_to_vmem [thread:$0]  %s61_s28, 2048, %s63_s8, [#allocation9], %s601_s29, %s601_s29, %s602_s30  }
   0xb   :  { %s604_s13 = smov [#allocation2]   ;;  %s605_s15 = smov [#allocation7]  }
   0xc   :  { %s23_s14 = sshll.u32 %s604_s13, 4  ;;  %s49_s0 = sshll.u32 %s605_s15, 4  ;;  %s24_s14 = int_to_ptr.vmem [resolvable:$true] %s23_s14  ;;  %s50_s0 = int_to_ptr.vmem [resolvable:$true] %s49_s0 }
   0xd   :  { %29 = dma.hbm_to_vmem [thread:$0]  %s22_s1, 256, %s24_s14, [#allocation3], %s601_s29, %s601_s29, %s602_s30  }
   0xe   :  { %s73_s18 = sshll.u32 %s710_s4, 4  ;;  %s606_s2 = smov [#allocation10]   ;;  %s74_s18 = int_to_ptr.hbm [resolvable:$true] %s73_s18 }
   0xf   :  { %55 = dma.hbm_to_vmem [thread:$0]  %s48_s12, 2048, %s50_s0, [#allocation6], %s601_s29, %s601_s29, %s602_s30  }
  0x10   :  { %s75_s19 = sshll.u32 %s606_s2, 4  ;;  %s76_s19 = int_to_ptr.vmem [resolvable:$true] %s75_s19 }
  0x11   :  { %81 = dma.hbm_to_vmem [thread:$0]  %s74_s18, 2048, %s76_s19, [#allocation9], %s601_s29, %s601_s29, %s602_s30  }
  0x12   :  { %590 = dma.done.wait [#allocation3], 256  }
  0x13   :  { %591 = vsyncadd [#allocation3], 4294967040 }
  0x14   :  { %592 = dma.done.wait [#allocation6], 6144  }
  0x15   :  { %593 = vsyncadd [#allocation6], 4294961152 }
  0x16   :  { %594 = dma.done.wait [#allocation9], 4096  }
  0x17   :  { %595 = vsyncadd [#allocation9], 4294963200  ;;  %v119_v0 = vld [vmem:[#allocation7 + $0x78] sm:$0xff]  ;;  %v118_v1 = vld [vmem:[#allocation7 + $0x70] sm:$0xff]  ;;  %v215_v52 = vlaneseq  ;;  %s607_s4 = smov [#allocation12]   ;;  %s381_s23 = sshll.u32 %s712_s6, 4  ;;  %s382_s23 = int_to_ptr.hbm [resolvable:$true] %s381_s23 }
  0x18   :  { %120 = vmatpush.msra.mxu1 %v119_v0  ;;  %v117_v2 = vld [vmem:[#allocation7 + $0x68] sm:$0xff]  ;;  %v116_v3 = vld [vmem:[#allocation7 + $0x60] sm:$0xff]  ;;  %v115_v4 = vld [vmem:[#allocation7 + $0x58] sm:$0xff]  ;;  %s379_s20 = sshll.u32 %s607_s4, 4  ;;  %s608_s24 = smov [#allocation11]   ;;  %s380_s20 = int_to_ptr.vmem [resolvable:$true] %s379_s20 }
  0x19   :  { %v114_v5 = vld [vmem:[#allocation7 + $0x50] sm:$0xff]  ;;  %v158_v6 = vld [vmem:[#allocation5 + $0x78] sm:$0xff]  ;;  %v113_v8 = vld [vmem:[#allocation7 + $0x48] sm:$0xff]  ;;  %v216_v53 = vand.u32 127, %v215_v52  ;;  %s366_s25 = sshll.u32 %s608_s24, 4  ;;  %s368_s27 = sshll.u32 %s711_s5, 4  ;;  %s367_s25 = int_to_ptr.vmem [resolvable:$true] %s366_s25  ;;  %s369_s27 = int_to_ptr.hbm [resolvable:$true] %s368_s27 }
  0x1a   :  { %121 = vmatpush.msra.mxu1 %v118_v1  ;;  %v174_v7 = vld [vmem:[#allocation5 + $0xf8] sm:$0xff]  ;;  %238 = vmatpush.msra.mxu3 %v158_v6  ;;  %v157_v9 = vld [vmem:[#allocation5 + $0x70] sm:$0xff]  ;;  %v112_v10 = vld [vmem:[#allocation7 + $0x40] sm:$0xff] }
  0x1b   :  { %195 = vmatpush.xpose.msra.mxu2 %v174_v7  ;;  %258 = vmatpush.msra.mxu0 %v174_v7  ;;  %v156_v11 = vld [vmem:[#allocation5 + $0x68] sm:$0xff]  ;;  %v173_v12 = vld [vmem:[#allocation5 + $0xf0] sm:$0xff]  ;;  %v111_v13 = vld [vmem:[#allocation7 + $0x38] sm:$0xff]  ;;  %vm217_vm0 = vcmp.lt.s32.totalorder %v216_v53, 8 }
  0x1c   :  { %122 = vmatpush.msra.mxu1 %v117_v2  ;;  %239 = vmatpush.msra.mxu3 %v157_v9  ;;  %v674_v14 = vld [vmem:[#allocation5 + $0x60] sm:$0xff]  ;;  %v110_v15 = vld [vmem:[#allocation7 + $0x30] sm:$0xff]  ;;  %v677_v16 = vld [vmem:[#allocation5 + $0x58] sm:$0xff] }
  0x1d   :  { %259 = vmatpush.msra.mxu0 %v173_v12  ;;  %v172_v17 = vld [vmem:[#allocation5 + $0xe8] sm:$0xff]  ;;  %v680_v19 = vld [vmem:[#allocation5 + $0x50] sm:$0xff]  ;;  %v108_v20 = vld [vmem:[#allocation7 + $0x20] sm:$0xff] }
  0x1e   :  { %123 = vmatpush.msra.mxu1 %v116_v3  ;;  %240 = vmatpush.msra.mxu3 %v156_v11  ;;  %v109_v18 = vld [vmem:[#allocation7 + $0x28] sm:$0xff]  ;;  %v171_v21 = vld [vmem:[#allocation5 + $0xe0] sm:$0xff]  ;;  %v107_v23 = vld [vmem:[#allocation7 + $0x18] sm:$0xff] }
  0x1f   :  { %196 = vmatpush.xpose.msra.mxu2 %v173_v12  ;;  %260 = vmatpush.msra.mxu0 %v172_v17  ;;  %v152_v22 = vld [vmem:[#allocation5 + $0x48] sm:$0xff]  ;;  %v106_v24 = vld [vmem:[#allocation7 + $0x10] sm:$0xff]  ;;  %v170_v25 = vld [vmem:[#allocation5 + $0xd8] sm:$0xff] }
  0x20   :  { %124 = vmatpush.msra.mxu1 %v115_v4  ;;  %241 = vmatpush.msra.mxu3 %v674_v14  ;;  %v151_v26 = vld [vmem:[#allocation5 + $0x40] sm:$0xff]  ;;  %v105_v27 = vld [vmem:[#allocation7 + $0x8] sm:$0xff]  ;;  %v102_v29 = vld [vmem:[#allocation2] sm:$0xff] }
  0x21   :  { %261 = vmatpush.msra.mxu0 %v171_v21  ;;  %v104_v28 = vld [vmem:[#allocation7] sm:$0xff]  ;;  %v169_v30 = vld [vmem:[#allocation5 + $0xd0] sm:$0xff]  ;;  %v150_v31 = vld [vmem:[#allocation5 + $0x38] sm:$0xff] }
  0x22   :  { %125 = vmatpush.msra.mxu1 %v114_v5  ;;  %242 = vmatpush.msra.mxu3 %v677_v16  ;;  %v168_v32 = vld [vmem:[#allocation5 + $0xc8] sm:$0xff]  ;;  %v149_v33 = vld [vmem:[#allocation5 + $0x30] sm:$0xff]  ;;  %v103_v34 = vld [vmem:[#allocation2 + $0x8] sm:$0xff] }
  0x23   :  { %197 = vmatpush.xpose.msra.mxu2 %v172_v17  ;;  %262 = vmatpush.msra.mxu0 %v170_v25  ;;  %v167_v35 = vld [vmem:[#allocation5 + $0xc0] sm:$0xff]  ;;  %v148_v36 = vld [vmem:[#allocation5 + $0x28] sm:$0xff]  ;;  %v166_v37 = vld [vmem:[#allocation5 + $0xb8] sm:$0xff] }
  0x24   :  { %126 = vmatpush.msra.mxu1 %v113_v8  ;;  %243 = vmatpush.msra.mxu3 %v680_v19  ;;  %v147_v38 = vld [vmem:[#allocation5 + $0x20] sm:$0xff]  ;;  %v165_v39 = vld [vmem:[#allocation5 + $0xb0] sm:$0xff]  ;;  %v146_v40 = vld [vmem:[#allocation5 + $0x18] sm:$0xff] }
  0x25   :  { %263 = vmatpush.msra.mxu0 %v169_v30  ;;  %v164_v41 = vld [vmem:[#allocation5 + $0xa8] sm:$0xff]  ;;  %v145_v42 = vld [vmem:[#allocation5 + $0x10] sm:$0xff]  ;;  %v163_v43 = vld [vmem:[#allocation5 + $0xa0] sm:$0xff] }
  0x26   :  { %127 = vmatpush.msra.mxu1 %v112_v10  ;;  %244 = vmatpush.msra.mxu3 %v152_v22  ;;  %v144_v44 = vld [vmem:[#allocation5 + $0x8] sm:$0xff]  ;;  %v162_v45 = vld [vmem:[#allocation5 + $0x98] sm:$0xff]  ;;  %v143_v46 = vld [vmem:[#allocation5] sm:$0xff] }
  0x27   :  { %198 = vmatpush.xpose.msra.mxu2 %v171_v21  ;;  %264 = vmatpush.msra.mxu0 %v168_v32  ;;  %v161_v47 = vld [vmem:[#allocation5 + $0x90] sm:$0xff]  ;;  %v160_v48 = vld [vmem:[#allocation5 + $0x88] sm:$0xff]  ;;  %v159_v49 = vld [vmem:[#allocation5 + $0x80] sm:$0xff] }
  0x28   :  { %128 = vmatpush.msra.mxu1 %v111_v13  ;;  %245 = vmatpush.msra.mxu3 %v151_v26  ;;  %v309_v58 = vld [vmem:[#allocation10 + $0x78] sm:$0xff]  ;;  %v308_v59 = vld [vmem:[#allocation10 + $0x70] sm:$0xff]  ;;  %v307_v60 = vld [vmem:[#allocation10 + $0x68] sm:$0xff] }
  0x29   :  { %265 = vmatpush.msra.mxu0 %v167_v35  ;;  %v306_v61 = vld [vmem:[#allocation10 + $0x60] sm:$0xff]  ;;  %v305_v63 = vld [vmem:[#allocation10 + $0x58] sm:$0xff]  ;;  %v304_v1 = vld [vmem:[#allocation10 + $0x50] sm:$0xff] }
  0x2a   :  { %129 = vmatpush.msra.mxu1 %v110_v15  ;;  %246 = vmatpush.msra.mxu3 %v150_v31  ;;  %v303_v3 = vld [vmem:[#allocation10 + $0x48] sm:$0xff]  ;;  %v301_v10 = vld [vmem:[#allocation10 + $0x38] sm:$0xff]  ;;  %v298_v13 = vld [vmem:[#allocation10 + $0x20] sm:$0xff] }
  0x2b   :  { %199 = vmatpush.xpose.msra.mxu2 %v170_v25  ;;  %266 = vmatpush.msra.mxu0 %v166_v37  ;;  %v299_v12 = vld [vmem:[#allocation10 + $0x28] sm:$0xff]  ;;  %v296_v15 = vld [vmem:[#allocation10 + $0x10] sm:$0xff]  ;;  %v294_v17 = vld [vmem:[#allocation10] sm:$0xff] }
  0x2c   :  { %130 = vmatpush.msra.mxu1 %v109_v18  ;;  %247 = vmatpush.msra.mxu3 %v149_v33  ;;  %v293_v18 = vld [vmem:[#allocation8 + $0x78] sm:$0xff]  ;;  %v290_v21 = vld [vmem:[#allocation8 + $0x60] sm:$0xff]  ;;  %v287_v25 = vld [vmem:[#allocation8 + $0x48] sm:$0xff] }
  0x2d   :  { %267 = vmatpush.msra.mxu0 %v165_v39 }
  0x2e   :  { %131 = vmatpush.msra.mxu1 %v108_v20  ;;  %248 = vmatpush.msra.mxu3 %v148_v36  ;;  %v291_v20 = vld [vmem:[#allocation8 + $0x68] sm:$0xff] }
  0x2f   :  { %200 = vmatpush.xpose.msra.mxu2 %v169_v30  ;;  %268 = vmatpush.msra.mxu0 %v164_v41  ;;  %v284_v30 = vld [vmem:[#allocation8 + $0x30] sm:$0xff] }
  0x30   :  { %132 = vmatpush.msra.mxu1 %v107_v23  ;;  %249 = vmatpush.msra.mxu3 %v147_v38  ;;  %v289_v23 = vld [vmem:[#allocation8 + $0x58] sm:$0xff] }
  0x31   :  { %269 = vmatpush.msra.mxu0 %v163_v43 }
  0x32   :  { %133 = vmatpush.msra.mxu1 %v106_v24  ;;  %250 = vmatpush.msra.mxu3 %v146_v40  ;;  %v288_v24 = vld [vmem:[#allocation8 + $0x50] sm:$0xff] }
  0x33   :  { %201 = vmatpush.xpose.msra.mxu2 %v168_v32  ;;  %270 = vmatpush.msra.mxu0 %v162_v45 }
  0x34   :  { %134 = vmatpush.msra.mxu1 %v105_v27  ;;  %251 = vmatpush.msra.mxu3 %v145_v42 }
  0x35   :  { %271 = vmatpush.msra.mxu0 %v161_v47 }
  0x36   :  { %135 = vmatpush.msra.mxu1 %v104_v28  ;;  %252 = vmatpush.msra.mxu3 %v144_v44 }
  0x37   :  { %136 = vmatmul.f32.vlgmr.msra.gmra.mxu1 %v102_v29  ;;  %202 = vmatpush.xpose.msra.mxu2 %v167_v35  ;;  %v285_v29 = vld [vmem:[#allocation8 + $0x38] sm:$0xff]  ;;  %v280_v35 = vld [vmem:[#allocation8 + $0x10] sm:$0xff] }
  0x38   :  { %175 = vmatpush.xpose.msrb.mxu1 %v158_v6  ;;  %253 = vmatpush.msra.mxu3 %v143_v46 }
  0x39   :  { %272 = vmatpush.msra.mxu0 %v160_v48 }
  0x3a   :  { %310 = vmatpush.msrb.mxu3 %v309_v58 }
  0x3b   :  { %203 = vmatpush.xpose.msra.mxu2 %v166_v37  ;;  %273 = vmatpush.msra.mxu0 %v159_v49 }
  0x3c   :  { %176 = vmatpush.xpose.msrb.mxu1 %v157_v9  ;;  %311 = vmatpush.msrb.mxu3 %v308_v59  ;;  %v302_v9 = vld [vmem:[#allocation10 + $0x40] sm:$0xff] }
  0x3d   :  { %333 = vmatpush.msrb.mxu0 %v293_v18 }
  0x3e   :  { %312 = vmatpush.msrb.mxu3 %v307_v60 }
  0x3f   :  { %139 = vmatmul.f32.gmra.mxu1 %v103_v34  ;;  %204 = vmatpush.xpose.msra.mxu2 %v165_v39  ;;  %v281_v34 = vld [vmem:[#allocation8 + $0x18] sm:$0xff]  ;;  %v278_v39 = vld [vmem:[#allocation8] sm:$0xff] }
  0x40   :  { %177 = vmatpush.xpose.msrb.mxu1 %v156_v11  ;;  %313 = vmatpush.msrb.mxu3 %v306_v61  ;;  %v300_v11 = vld [vmem:[#allocation10 + $0x30] sm:$0xff] }
  0x42   :  { %314 = vmatpush.msrb.mxu3 %v305_v63 }
  0x43   :  { %205 = vmatpush.xpose.msra.mxu2 %v164_v41 }
  0x44   :  { %178 = vmatpush.xpose.msrb.mxu1 %v674_v14  ;;  %315 = vmatpush.msrb.mxu3 %v304_v1  ;;  %v297_v14 = vld [vmem:[#allocation10 + $0x18] sm:$0xff] }
  0x46   :  { %316 = vmatpush.msrb.mxu3 %v303_v3 }
  0x47   :  { %206 = vmatpush.xpose.msra.mxu2 %v163_v43 }
  0x48   :  { %179 = vmatpush.xpose.msrb.mxu1 %v677_v16  ;;  %317 = vmatpush.msrb.mxu3 %v302_v9  ;;  %v295_v16 = vld [vmem:[#allocation10 + $0x8] sm:$0xff] }
  0x4a   :  { %318 = vmatpush.msrb.mxu3 %v301_v10 }
  0x4b   :  { %207 = vmatpush.xpose.msra.mxu2 %v162_v45 }
  0x4c   :  { %180 = vmatpush.xpose.msrb.mxu1 %v680_v19  ;;  %319 = vmatpush.msrb.mxu3 %v300_v11  ;;  %v292_v19 = vld [vmem:[#allocation8 + $0x70] sm:$0xff] }
  0x4d   :  { %334 = vmatpush.msrb.mxu0 %v292_v19 }
  0x4e   :  { %320 = vmatpush.msrb.mxu3 %v299_v12 }
  0x4f   :  { %208 = vmatpush.xpose.msra.mxu2 %v161_v47  ;;  %335 = vmatpush.msrb.mxu0 %v291_v20 }
  0x50   :  { %181 = vmatpush.xpose.msrb.mxu1 %v152_v22  ;;  %321 = vmatpush.msrb.mxu3 %v298_v13 }
  0x51   :  { %336 = vmatpush.msrb.mxu0 %v290_v21 }
  0x52   :  { %322 = vmatpush.msrb.mxu3 %v297_v14 }
  0x53   :  { %209 = vmatpush.xpose.msra.mxu2 %v160_v48  ;;  %337 = vmatpush.msrb.mxu0 %v289_v23 }
  0x54   :  { %182 = vmatpush.xpose.msrb.mxu1 %v151_v26  ;;  %323 = vmatpush.msrb.mxu3 %v296_v15  ;;  %v286_v26 = vld [vmem:[#allocation8 + $0x40] sm:$0xff] }
  0x55   :  { %338 = vmatpush.msrb.mxu0 %v288_v24 }
  0x56   :  { %324 = vmatpush.msrb.mxu3 %v295_v16 }
  0x57   :  { %210 = vmatpush.xpose.msra.mxu2 %v159_v49  ;;  %339 = vmatpush.msrb.mxu0 %v287_v25 }
  0x58   :  { %183 = vmatpush.xpose.msrb.mxu1 %v150_v31  ;;  %325 = vmatpush.msrb.mxu3 %v294_v17  ;;  %v283_v31 = vld [vmem:[#allocation8 + $0x28] sm:$0xff] }
  0x59   :  { %340 = vmatpush.msrb.mxu0 %v286_v26 }
  0x5b   :  { %341 = vmatpush.msrb.mxu0 %v285_v29 }
  0x5c   :  { %184 = vmatpush.xpose.msrb.mxu1 %v149_v33  ;;  %v282_v33 = vld [vmem:[#allocation8 + $0x20] sm:$0xff] }
  0x5d   :  { %342 = vmatpush.msrb.mxu0 %v284_v30 }
  0x5f   :  { %343 = vmatpush.msrb.mxu0 %v283_v31 }
  0x60   :  { %185 = vmatpush.xpose.msrb.mxu1 %v148_v36  ;;  %v279_v36 = vld [vmem:[#allocation8 + $0x8] sm:$0xff] }
  0x61   :  { %344 = vmatpush.msrb.mxu0 %v282_v33 }
  0x63   :  { %345 = vmatpush.msrb.mxu0 %v281_v34 }
  0x64   :  { %186 = vmatpush.xpose.msrb.mxu1 %v147_v38 }
  0x65   :  { %346 = vmatpush.msrb.mxu0 %v280_v35 }
  0x67   :  { %347 = vmatpush.msrb.mxu0 %v279_v36 }
  0x68   :  { %187 = vmatpush.xpose.msrb.mxu1 %v146_v40 }
  0x69   :  { %348 = vmatpush.msrb.mxu0 %v278_v39 }
  0x6c   :  { %188 = vmatpush.xpose.msrb.mxu1 %v145_v42 }
  0x70   :  { %189 = vmatpush.xpose.msrb.mxu1 %v144_v44 }
  0x74   :  { %190 = vmatpush.xpose.msrb.mxu1 %v143_v46 }
  0xb4   :  { %v686_v50 = vpop.f32.mrf.mxu1 }
  0xb5   :  { %191 = vmatmul.f32.vlgmr.msrb.gmra.mxu1 %v686_v50 }
  0xbc   :  { %v689_v51 = vpop.f32.mrf.mxu1 }
  0xbd   :  { %211 = vmatmul.f32.vlgmr.msra.gmra.mxu2 %v689_v51 }
 0x132   :  { %v192_v54 = vpop.f32.mrf.mxu1 }
 0x133   :  { %v218_v55 = vsel %vm217_vm0, %v192_v54, -1e+30 }
 0x134   :  { %220 = vmax.xlane.f32.xlu0 %v218_v55 }
 0x140   :  { %v212_v56 = vpop.f32.mrf.mxu2 }
 0x141   :  { %v219_v57 = vsel %vm217_vm0, %v212_v56, -1e+30 }
 0x142   :  { %222 = vmax.xlane.f32.xlu0 %v219_v57 }
 0x1a7   :  { %v221_v62 = vpop.xlane.xlu0 %220 }
 0x1a8   :  { %v224_v0 = vsub.f32 %v218_v55, %v221_v62 }
 0x1aa   :  { %v226_v2 = vmul.f32 1.442695, %v224_v0 }
 0x1ac   :  { %410 = vpow2.f32 %v226_v2 }
 0x1b2   :  { %v411_v4 = vpop.eup %410 }
 0x1b3   :  { %230 = vadd.xlane.f32.xlu1 %v411_v4 }
 0x1b5   :  { %v223_v5 = vpop.xlane.xlu0 %222 }
 0x1b6   :  { %v225_v6 = vsub.f32 %v219_v57, %v223_v5 }
 0x1b8   :  { %v228_v7 = vmul.f32 1.442695, %v225_v6 }
 0x1ba   :  { %412 = vpow2.f32 %v228_v7 }
 0x1c0   :  { %v413_v8 = vpop.eup %412 }
 0x1c1   :  { %232 = vadd.xlane.f32.xlu1 %v413_v8 }
 0x226   :  { %v231_v22 = vpop.xlane.xlu1 %230 }
 0x227   :  { %414 = vrcp.f32 %v231_v22 }
 0x22d   :  { %v415_v27 = vpop.eup %414 }
 0x22e   :  { %v236_v28 = vmul.f32 %v415_v27, %v411_v4 }
 0x230   :  { %254 = vmatmul.f32.vlgmr.msra.gmra.mxu3 %v236_v28  ;;  %360 = vst [vmem:[#allocation12] sm:$0xff] %v236_v28 }
 0x234   :  { %v233_v32 = vpop.xlane.xlu1 %232 }
 0x235   :  { %416 = vrcp.f32 %v233_v32 }
 0x238   :  { %326 = vmatmul.f32.vlgmr.msrb.gmra.mxu3 %v686_v50 }
 0x23b   :  { %v417_v37 = vpop.eup %416 }
 0x23c   :  { %v237_v38 = vmul.f32 %v417_v37, %v413_v8 }
 0x23e   :  { %274 = vmatmul.f32.vlgmr.msra.gmra.mxu0 %v237_v38  ;;  %361 = vst [vmem:[#allocation12 + $0x8] sm:$0xff] %v237_v38 }
 0x23f   :  { %387 = dma.vmem_to_hbm [thread:$0]  %s380_s20, 256, %s382_s23, [#allocation13], %s601_s29, %s601_s29, %s602_s30  }
 0x240   :  { %329 = vmatmul.f32.gmra.mxu3 %v689_v51 }
 0x2b3   :  { %v255_v40 = vpop.f32.mrf.mxu3 }
 0x2b4   :  { %349 = vmatmul.f32.vlgmr.msrb.gmra.mxu0 %v255_v40 }
 0x2bb   :  { %v275_v41 = vpop.f32.mrf.mxu0  ;;  %v327_v42 = vpop.f32.mrf.mxu3 }
 0x2bc   :  { %352 = vmatmul.f32.gmra.mxu0 %v275_v41 }
 0x2c3   :  { %v330_v45 = vpop.f32.mrf.mxu3 }
 0x331   :  { %v350_v43 = vpop.f32.mrf.mxu0 }
 0x332   :  { %v351_v44 = vadd.f32 %v350_v43, %v327_v42 }
 0x334   :  { %418 = vtanh.f32 %v351_v44 }
 0x339   :  { %v353_v46 = vpop.f32.mrf.mxu0 }
 0x33a   :  { %v419_v47 = vpop.eup %418  ;;  %v354_v48 = vadd.f32 %v353_v46, %v330_v45 }
 0x33b   :  { %358 = vst [vmem:[#allocation11] sm:$0xff] %v419_v47 }
 0x33c   :  { %420 = vtanh.f32 %v354_v48 }
 0x342   :  { %v421_v49 = vpop.eup %420 }
 0x343   :  { %359 = vst [vmem:[#allocation11 + $0x8] sm:$0xff] %v421_v49 }
 0x344   :  { %374 = dma.vmem_to_hbm [thread:$0]  %s367_s25, 256, %s369_s27, [#allocation4], %s601_s29, %s601_s29, %s602_s30  }
 0x345   :  { %596 = dma.done.wait [#allocation4], 256  }
 0x346   :  { %597 = vsyncadd [#allocation4], 4294967040 }
 0x347   :  { %598 = dma.done.wait [#allocation13], 256  }
 0x348   :  { %599 = vsyncadd [#allocation13], 4294967040 }
 0x349   :  { %396 = vsyncpa [#allocation3], 1 }
 0x34a   :  { %397 = vsyncpa [#allocation6], 1 }
 0x34b   :  { %398 = vsyncpa [#allocation9], 1 }
 0x34c   :  { %399 = vsyncpa [#allocation4], 1 }
 0x34d   :  { %400 = vsyncpa [#allocation13], 1 }

</bundles_post_ra>
